<compile_context>
chip_gen: v7x
topology: tpu7x:2x2x1
jax: 0.10.0
libtpu: 0.0.40
codegen_flags: <defaults>
</compile_context>

<pallas_src>
import functools

import jax
import jax.numpy as jnp
from jax.experimental import pallas as pl
from jax.experimental.pallas import tpu as pltpu

LANE = 128
SUBLANE = 8
LN_EPS = 1e-5


def _leaky_relu(x, slope=0.1):
    return jnp.where(x > 0, x, slope * x)


def _round_up(n, m):
    return (n + m - 1) // m * m


def _round_down(n, m):
    return (n // m) * m


def _vmem_capacity_bytes():
    try:
        return int(pltpu.get_tpu_info().vmem_capacity_bytes)
    except Exception:
        return 64 * 1024 * 1024          # conservative fallback (v7x per-TC VMEM)


def _invariant_spec(shape):
    """Grid-invariant operand: constant index map; single-buffered when supported."""
    idx = lambda i: (0, 0)
    try:
        return pl.BlockSpec(shape, idx, pipeline_mode=pl.Buffered(buffer_count=1))
    except TypeError:                    # older BlockSpec without pipeline_mode
        return pl.BlockSpec(shape, idx)


def netblock_kernel(x_ref, cond_ref, vin_ref, vout_ref,
                    w1_ref, wr_ref, wc_ref, w2_ref, o_ref,
                    *, dim_in, mxu_dtype):
    f32 = jnp.float32
    x = x_ref[...].astype(f32)                       # (bt, din_p); padded cols are 0

    # ---- LayerNorm over the TRUE dim_in (two-pass, masked variance) ----
    inv_n = 1.0 / dim_in
    mean = jnp.sum(x, axis=-1, keepdims=True) * inv_n         # zero pads don't contribute
    xc = x - mean
    xm = xc * vin_ref[2:3, :]                                  # valid-column mask (1/0)
    var = jnp.sum(xm * xm, axis=-1, keepdims=True) * inv_n
    h = xc * jax.lax.rsqrt(var + LN_EPS)
    h = h * vin_ref[0:1, :] + vin_ref[1:2, :]                  # ln_w / ln_b (pads are 0)

    # ---- condition pre-activation (LeakyReLU before its Linear) ----
    lc = _leaky_relu(cond_ref[...].astype(f32))

    # ---- block1 / residual / condition: three exact-size MXU passes (f32 accumulate) ----
    h1 = jnp.dot(h.astype(mxu_dtype), w1_ref[...],
                 preferred_element_type=f32) + vout_ref[0:1, :]
    h1 = _leaky_relu(h1)
    r = jnp.dot(x.astype(mxu_dtype), wr_ref[...],
                preferred_element_type=f32) + vout_ref[1:2, :]
    r = _leaky_relu(r)
    ce = jnp.dot(lc.astype(mxu_dtype), wc_ref[...],
                 preferred_element_type=f32) + vout_ref[2:3, :]
    h1 = h1 + ce

    # ---- block2: Linear(dim_out -> dim_out) + LeakyReLU ----
    h2 = jnp.dot(h1.astype(mxu_dtype), w2_ref[...],
                 preferred_element_type=f32) + vout_ref[3:4, :]
    h2 = _leaky_relu(h2)

    o_ref[...] = (h2 + r).astype(o_ref.dtype)


def prepare_params(params, *, dim_in, dim_out, cond_dim, mxu_dtype=jnp.bfloat16):
    """One-time packing/padding of NetBlock parameters (hoisted out of the forward)."""
    din_p = _round_up(dim_in, LANE)
    dc_p = _round_up(cond_dim, LANE)
    dout_p = _round_up(dim_out, LANE)
    f32 = jnp.float32

    vin = jnp.zeros((SUBLANE, din_p), f32)
    vin = vin.at[0, :dim_in].set(params["ln_w"].astype(f32))
    vin = vin.at[1, :dim_in].set(params["ln_b"].astype(f32))
    vin = vin.at[2, :dim_in].set(1.0)                 # valid-column mask for LN variance

    vout = jnp.zeros((SUBLANE, dout_p), f32)
    vout = vout.at[0, :dim_out].set(params["b1"].astype(f32))
    vout = vout.at[1, :dim_out].set(params["br"].astype(f32))
    vout = vout.at[2, :dim_out].set(params["bc"].astype(f32))
    vout = vout.at[3, :dim_out].set(params["b2"].astype(f32))

    def pad_w(w, rows, cols):
        wp = jnp.zeros((rows, cols), mxu_dtype)
        return wp.at[:w.shape[0], :w.shape[1]].set(w.astype(mxu_dtype))

    return dict(
        vin=vin, vout=vout,
        w1=pad_w(params["w1"], din_p, dout_p),
        wr=pad_w(params["wr"], din_p, dout_p),
        wc=pad_w(params["wc"], dc_p, dout_p),
        w2=pad_w(params["w2"], dout_p, dout_p),
        dims=(dim_in, dim_out, cond_dim),
        mxu_dtype=mxu_dtype,
    )


def netblock_forward(x, condition, packed, *, batch_tile=None, out_dtype=None):
    """x: [B, dim_in], condition: [B, cond_dim], packed: prepare_params(...) -> [B, dim_out]."""
    B, dim_in_x = x.shape
    dim_in, dim_out, cond_dim = packed["dims"]
    assert dim_in_x == dim_in and condition.shape == (B, cond_dim)
    mxu_dtype = packed["mxu_dtype"]
    out_dtype = x.dtype if out_dtype is None else out_dtype

    din_p, dout_p = packed["w1"].shape
    dc_p = packed["wc"].shape[0]

    w_bytes = jnp.dtype(mxu_dtype).itemsize
    act_bytes = jnp.dtype(x.dtype).itemsize
    out_bytes = jnp.dtype(out_dtype).itemsize

    # ---- per-generation VMEM budget ----
    vmem_cap = _vmem_capacity_bytes()
    vmem_budget = min(int(0.55 * vmem_cap), 96 * 1024 * 1024)
    vmem_limit = min(int(0.80 * vmem_cap), 100 * 1024 * 1024)

    # Invariant operands are single-buffered -> counted once.
    w_resident = ((2 * din_p + dout_p) * dout_p + dc_p * dout_p) * w_bytes \
                 + SUBLANE * (din_p + dout_p) * 4

    def vmem_est(t):
        io = 2 * t * ((din_p + dc_p) * act_bytes + dout_p * out_bytes)   # 2x-buffered tiles
        tmp = t * (3 * din_p + dc_p + 4 * dout_p) * 4                    # in-kernel f32 temps
        return io + tmp + w_resident

    # ---- batch tile ----
    B_al = _round_up(B, SUBLANE)
    if batch_tile is not None:
        bt = max(SUBLANE, _round_up(int(batch_tile), SUBLANE))
    else:
        bt = min(1024, B_al)
        if B_al > SUBLANE:        # keep >= 2 grid steps so v7x's 2 TCs can split the batch axis
            bt = min(bt, max(SUBLANE, _round_down(B_al // 2, SUBLANE)))
        while bt > SUBLANE and vmem_est(bt) > vmem_budget:
            bt = max(SUBLANE, _round_down(bt // 2, SUBLANE))
    B_pad = _round_up(B, bt)      # pad batch UP; never shrink bt to divide it
    grid = (B_pad // bt,)

    # ---- pad activations (lane-dense feature dims, bt-aligned batch) ----
    x_p = jnp.pad(x, ((0, B_pad - B), (0, din_p - dim_in)))
    c_p = jnp.pad(condition, ((0, B_pad - B), (0, dc_p - cond_dim)))

    kernel = functools.partial(netblock_kernel, dim_in=dim_in, mxu_dtype=mxu_dtype)

    flops = 2 * B * dim_out * (2 * dim_in + cond_dim + dim_out)
    bytes_accessed = ((x.size + condition.size) * act_bytes
                      + B * dim_out * out_bytes
                      + ((2 * din_p + dout_p) * dout_p + dc_p * dout_p) * w_bytes
                      + SUBLANE * (din_p + dout_p) * 4)

    out = pl.pallas_call(
        kernel,
        out_shape=jax.ShapeDtypeStruct((B_pad, dout_p), out_dtype),
        grid_spec=pltpu.PrefetchScalarGridSpec(
            num_scalar_prefetch=0,
            grid=grid,
            in_specs=[
                pl.BlockSpec((bt, din_p), lambda i: (i, 0)),     # x
                pl.BlockSpec((bt, dc_p), lambda i: (i, 0)),      # condition
                _invariant_spec((SUBLANE, din_p)),               # ln_w / ln_b / mask
                _invariant_spec((SUBLANE, dout_p)),              # b1 / br / bc / b2
                _invariant_spec((din_p, dout_p)),                # w1
                _invariant_spec((din_p, dout_p)),                # wr
                _invariant_spec((dc_p, dout_p)),                 # wc
                _invariant_spec((dout_p, dout_p)),               # w2
            ],
            out_specs=pl.BlockSpec((bt, dout_p), lambda i: (i, 0)),
        ),
        compiler_params=pltpu.CompilerParams(
            dimension_semantics=("parallel",),
            vmem_limit_bytes=int(vmem_limit),
        ),
        cost_estimate=pl.CostEstimate(
            flops=int(flops),
            transcendentals=int(B),
            bytes_accessed=int(bytes_accessed),
        ),
    )(x_p, c_p, packed["vin"], packed["vout"],
      packed["w1"], packed["wr"], packed["wc"], packed["w2"])

    return out[:B, :dim_out]


def init_params(key, dim_in, dim_out, cond_dim):
    """Deterministic synthetic parameters (shapes mirror the PyTorch module)."""
    ks = jax.random.split(key, 8)

    def linear(k, fan_in, fan_out):
        kw, kb = jax.random.split(k)
        bound = 1.0 / jnp.sqrt(fan_in)
        w = jax.random.uniform(kw, (fan_in, fan_out), jnp.float32, -bound, bound)
        b = jax.random.uniform(kb, (fan_out,), jnp.float32, -bound, bound)
        return w, b

    w1, b1 = linear(ks[0], dim_in, dim_out)      # block1.lin
    w2, b2 = linear(ks[1], dim_out, dim_out)     # block2.lin
    wc, bc = linear(ks[2], cond_dim, dim_out)    # condition_mlp[1]
    wr, br = linear(ks[3], dim_in, dim_out)      # res_block.lin (dim_in != dim_out)
    ln_w = jnp.ones((dim_in,), jnp.float32)
    ln_b = jnp.zeros((dim_in,), jnp.float32)
    return dict(ln_w=ln_w, ln_b=ln_b, w1=w1, b1=b1, wc=wc, bc=bc,
                w2=w2, b2=b2, wr=wr, br=br)


def _reference(x, condition, p):
    """Pure-JAX reference of the PyTorch forward (norm=True, res_unit=True, cond given)."""
    mean = jnp.mean(x, -1, keepdims=True)
    var = jnp.mean((x - mean) ** 2, -1, keepdims=True)
    h = (x - mean) / jnp.sqrt(var + LN_EPS) * p["ln_w"] + p["ln_b"]
    h = _leaky_relu(h @ p["w1"] + p["b1"])
    h = h + (_leaky_relu(condition) @ p["wc"] + p["bc"])
    h = _leaky_relu(h @ p["w2"] + p["b2"])
    return h + _leaky_relu(x @ p["wr"] + p["br"])


if __name__ == "__main__":
    # NetBlock(dim_in=32, dim_out=64, condition_emb_dim=16, res_unit=True, norm=True)
    B, dim_in, dim_out, cond_dim = 16, 32, 64, 16

    key = jax.random.PRNGKey(0)
    kx, kc, kp = jax.random.split(key, 3)
    x = jax.random.normal(kx, (B, dim_in), jnp.float32)
    condition = jax.random.normal(kc, (B, cond_dim), jnp.float32)
    params = init_params(kp, dim_in, dim_out, cond_dim)
    ref = _reference(x, condition, params)

    # Check 1: exact-precision path (f32 MXU operands), tight tolerance, auto batch tile.
    packed_f32 = prepare_params(params, dim_in=dim_in, dim_out=dim_out,
                                cond_dim=cond_dim, mxu_dtype=jnp.float32)
    out = jax.block_until_ready(netblock_forward(x, condition, packed_f32))
    assert out.shape == (B, dim_out)
    assert jnp.allclose(out, ref, atol=1e-4, rtol=1e-4), "mismatch vs reference (f32)"

    # Check 2: default bf16 MXU path; awkward batch exercises batch padding + multi-step grid.
    packed_bf16 = prepare_params(params, dim_in=dim_in, dim_out=dim_out, cond_dim=cond_dim)
    B2 = 20
    x2 = jax.random.normal(jax.random.PRNGKey(1), (B2, dim_in), jnp.float32)
    c2 = jax.random.normal(jax.random.PRNGKey(2), (B2, cond_dim), jnp.float32)
    out2 = jax.block_until_ready(netblock_forward(x2, c2, packed_bf16, batch_tile=8))
    ref2 = _reference(x2, c2, params)
    assert out2.shape == (B2, dim_out)
    assert jnp.allclose(out2, ref2, atol=6e-2, rtol=6e-2), "mismatch vs reference (bf16)"

    print("KERNEL_OK")
</pallas_src>

<mosaic_0001>
module attributes {stable_mosaic.version = 11 : i64} {
  func.func @netblock_kernel(%arg0: i32, %arg1: memref<8x128xf32, #tpu.memory_space<vmem>>, %arg2: memref<8x128xf32, #tpu.memory_space<vmem>>, %arg3: memref<8x128xf32, #tpu.memory_space<vmem>>, %arg4: memref<8x128xf32, #tpu.memory_space<vmem>>, %arg5: memref<128x128xf32, #tpu.memory_space<vmem>>, %arg6: memref<128x128xf32, #tpu.memory_space<vmem>>, %arg7: memref<128x128xf32, #tpu.memory_space<vmem>>, %arg8: memref<128x128xf32, #tpu.memory_space<vmem>>, %arg9: memref<8x128xf32, #tpu.memory_space<vmem>>) attributes {dimension_semantics = [#tpu.dimension_semantics<parallel>], iteration_bounds = array<i64: 2>, scalar_prefetch = 0 : i64, scratch_operands = 0 : i64, tpu.core_type = #tpu.core_type<tc>, window_params = [{transform_indices = @transform_0, window_bounds = array<i64: 8, 128>}, {transform_indices = @transform_1, window_bounds = array<i64: 8, 128>}, {pipeline_mode = #tpu.pipeline_mode<synchronous>, transform_indices = @transform_2, window_bounds = array<i64: 8, 128>}, {pipeline_mode = #tpu.pipeline_mode<synchronous>, transform_indices = @transform_3, window_bounds = array<i64: 8, 128>}, {pipeline_mode = #tpu.pipeline_mode<synchronous>, transform_indices = @transform_4, window_bounds = array<i64: 128, 128>}, {pipeline_mode = #tpu.pipeline_mode<synchronous>, transform_indices = @transform_5, window_bounds = array<i64: 128, 128>}, {pipeline_mode = #tpu.pipeline_mode<synchronous>, transform_indices = @transform_6, window_bounds = array<i64: 128, 128>}, {pipeline_mode = #tpu.pipeline_mode<synchronous>, transform_indices = @transform_7, window_bounds = array<i64: 128, 128>}, {transform_indices = @transform_8, window_bounds = array<i64: 8, 128>}]} {
    %c0 = arith.constant 0 : index
    %c0_0 = arith.constant 0 : index
    %0 = vector.load %arg1[%c0, %c0_0] : memref<8x128xf32, #tpu.memory_space<vmem>>, vector<8x128xf32>
    %cst = arith.constant dense<0.000000e+00> : vector<8xf32>
    %1 = vector.multi_reduction <add>, %0, %cst [1] : vector<8x128xf32> to vector<8xf32>
    %2 = vector.shape_cast %1 : vector<8xf32> to vector<8x1xf32>
    %cst_1 = arith.constant 3.125000e-02 : f32
    %3 = vector.broadcast %cst_1 : f32 to vector<8x1xf32>
    %4 = arith.mulf %2, %3 : vector<8x1xf32>
    %5 = vector.broadcast %4 : vector<8x1xf32> to vector<8x128xf32>
    %6 = arith.subf %0, %5 : vector<8x128xf32>
    %c2 = arith.constant 2 : index
    %c0_2 = arith.constant 0 : index
    %7 = vector.load %arg3[%c2, %c0_2] : memref<8x128xf32, #tpu.memory_space<vmem>>, vector<1x128xf32>
    %8 = vector.broadcast %7 : vector<1x128xf32> to vector<8x128xf32>
    %9 = arith.mulf %6, %8 : vector<8x128xf32>
    %10 = arith.mulf %9, %9 : vector<8x128xf32>
    %cst_3 = arith.constant dense<0.000000e+00> : vector<8xf32>
    %11 = vector.multi_reduction <add>, %10, %cst_3 [1] : vector<8x128xf32> to vector<8xf32>
    %12 = vector.shape_cast %11 : vector<8xf32> to vector<8x1xf32>
    %cst_4 = arith.constant 3.125000e-02 : f32
    %13 = vector.broadcast %cst_4 : f32 to vector<8x1xf32>
    %14 = arith.mulf %12, %13 : vector<8x1xf32>
    %cst_5 = arith.constant 9.99999974E-6 : f32
    %15 = vector.broadcast %cst_5 : f32 to vector<8x1xf32>
    %16 = arith.addf %14, %15 : vector<8x1xf32>
    %17 = math.rsqrt %16 : vector<8x1xf32>
    %18 = vector.broadcast %17 : vector<8x1xf32> to vector<8x128xf32>
    %19 = arith.mulf %6, %18 : vector<8x128xf32>
    %c0_6 = arith.constant 0 : index
    %c0_7 = arith.constant 0 : index
    %20 = vector.load %arg3[%c0_6, %c0_7] : memref<8x128xf32, #tpu.memory_space<vmem>>, vector<1x128xf32>
    %21 = vector.broadcast %20 : vector<1x128xf32> to vector<8x128xf32>
    %22 = arith.mulf %19, %21 : vector<8x128xf32>
    %c1 = arith.constant 1 : index
    %c0_8 = arith.constant 0 : index
    %23 = vector.load %arg3[%c1, %c0_8] : memref<8x128xf32, #tpu.memory_space<vmem>>, vector<1x128xf32>
    %24 = vector.broadcast %23 : vector<1x128xf32> to vector<8x128xf32>
    %25 = arith.addf %22, %24 : vector<8x128xf32>
    %c0_9 = arith.constant 0 : index
    %c0_10 = arith.constant 0 : index
    %26 = vector.load %arg2[%c0_9, %c0_10] : memref<8x128xf32, #tpu.memory_space<vmem>>, vector<8x128xf32>
    %cst_11 = arith.constant 0.000000e+00 : f32
    %27 = vector.broadcast %cst_11 : f32 to vector<8x128xf32>
    %28 = arith.cmpf ogt, %26, %27 : vector<8x128xf32>
    %cst_12 = arith.constant 1.000000e-01 : f32
    %29 = vector.broadcast %cst_12 : f32 to vector<8x128xf32>
    %30 = arith.mulf %29, %26 : vector<8x128xf32>
    %31 = arith.select %28, %26, %30 : vector<8x128xi1>, vector<8x128xf32>
    %c0_13 = arith.constant 0 : index
    %c0_14 = arith.constant 0 : index
    %32 = vector.load %arg5[%c0_13, %c0_14] : memref<128x128xf32, #tpu.memory_space<vmem>>, vector<128x128xf32>
    %cst_15 = arith.constant dense<0.000000e+00> : vector<8x128xf32>
    %33 = tpu.matmul %25, %32, %cst_15 {dimension_numbers = #tpu.dot_dimension_numbers<[1], [0], [0], [1], [0, 0, 1, 1], [], []>} : vector<8x128xf32>, vector<128x128xf32>, vector<8x128xf32> -> vector<8x128xf32>
    %c0_16 = arith.constant 0 : index
    %c0_17 = arith.constant 0 : index
    %34 = vector.load %arg4[%c0_16, %c0_17] : memref<8x128xf32, #tpu.memory_space<vmem>>, vector<1x128xf32>
    %35 = vector.broadcast %34 : vector<1x128xf32> to vector<8x128xf32>
    %36 = arith.addf %33, %35 : vector<8x128xf32>
    %cst_18 = arith.constant 0.000000e+00 : f32
    %37 = vector.broadcast %cst_18 : f32 to vector<8x128xf32>
    %38 = arith.cmpf ogt, %36, %37 : vector<8x128xf32>
    %cst_19 = arith.constant 1.000000e-01 : f32
    %39 = vector.broadcast %cst_19 : f32 to vector<8x128xf32>
    %40 = arith.mulf %39, %36 : vector<8x128xf32>
    %41 = arith.select %38, %36, %40 : vector<8x128xi1>, vector<8x128xf32>
    %c0_20 = arith.constant 0 : index
    %c0_21 = arith.constant 0 : index
    %42 = vector.load %arg6[%c0_20, %c0_21] : memref<128x128xf32, #tpu.memory_space<vmem>>, vector<128x128xf32>
    %cst_22 = arith.constant dense<0.000000e+00> : vector<8x128xf32>
    %43 = tpu.matmul %0, %42, %cst_22 {dimension_numbers = #tpu.dot_dimension_numbers<[1], [0], [0], [1], [0, 0, 1, 1], [], []>} : vector<8x128xf32>, vector<128x128xf32>, vector<8x128xf32> -> vector<8x128xf32>
    %c1_23 = arith.constant 1 : index
    %c0_24 = arith.constant 0 : index
    %44 = vector.load %arg4[%c1_23, %c0_24] : memref<8x128xf32, #tpu.memory_space<vmem>>, vector<1x128xf32>
    %45 = vector.broadcast %44 : vector<1x128xf32> to vector<8x128xf32>
    %46 = arith.addf %43, %45 : vector<8x128xf32>
    %cst_25 = arith.constant 0.000000e+00 : f32
    %47 = vector.broadcast %cst_25 : f32 to vector<8x128xf32>
    %48 = arith.cmpf ogt, %46, %47 : vector<8x128xf32>
    %cst_26 = arith.constant 1.000000e-01 : f32
    %49 = vector.broadcast %cst_26 : f32 to vector<8x128xf32>
    %50 = arith.mulf %49, %46 : vector<8x128xf32>
    %51 = arith.select %48, %46, %50 : vector<8x128xi1>, vector<8x128xf32>
    %c0_27 = arith.constant 0 : index
    %c0_28 = arith.constant 0 : index
    %52 = vector.load %arg7[%c0_27, %c0_28] : memref<128x128xf32, #tpu.memory_space<vmem>>, vector<128x128xf32>
    %cst_29 = arith.constant dense<0.000000e+00> : vector<8x128xf32>
    %53 = tpu.matmul %31, %52, %cst_29 {dimension_numbers = #tpu.dot_dimension_numbers<[1], [0], [0], [1], [0, 0, 1, 1], [], []>} : vector<8x128xf32>, vector<128x128xf32>, vector<8x128xf32> -> vector<8x128xf32>
    %c2_30 = arith.constant 2 : index
    %c0_31 = arith.constant 0 : index
    %54 = vector.load %arg4[%c2_30, %c0_31] : memref<8x128xf32, #tpu.memory_space<vmem>>, vector<1x128xf32>
    %55 = vector.broadcast %54 : vector<1x128xf32> to vector<8x128xf32>
    %56 = arith.addf %53, %55 : vector<8x128xf32>
    %57 = arith.addf %41, %56 : vector<8x128xf32>
    %c0_32 = arith.constant 0 : index
    %c0_33 = arith.constant 0 : index
    %58 = vector.load %arg8[%c0_32, %c0_33] : memref<128x128xf32, #tpu.memory_space<vmem>>, vector<128x128xf32>
    %cst_34 = arith.constant dense<0.000000e+00> : vector<8x128xf32>
    %59 = tpu.matmul %57, %58, %cst_34 {dimension_numbers = #tpu.dot_dimension_numbers<[1], [0], [0], [1], [0, 0, 1, 1], [], []>} : vector<8x128xf32>, vector<128x128xf32>, vector<8x128xf32> -> vector<8x128xf32>
    %c3 = arith.constant 3 : index
    %c0_35 = arith.constant 0 : index
    %60 = vector.load %arg4[%c3, %c0_35] : memref<8x128xf32, #tpu.memory_space<vmem>>, vector<1x128xf32>
    %61 = vector.broadcast %60 : vector<1x128xf32> to vector<8x128xf32>
    %62 = arith.addf %59, %61 : vector<8x128xf32>
    %cst_36 = arith.constant 0.000000e+00 : f32
    %63 = vector.broadcast %cst_36 : f32 to vector<8x128xf32>
    %64 = arith.cmpf ogt, %62, %63 : vector<8x128xf32>
    %cst_37 = arith.constant 1.000000e-01 : f32
    %65 = vector.broadcast %cst_37 : f32 to vector<8x128xf32>
    %66 = arith.mulf %65, %62 : vector<8x128xf32>
    %67 = arith.select %64, %62, %66 : vector<8x128xi1>, vector<8x128xf32>
    %68 = arith.addf %67, %51 : vector<8x128xf32>
    %c0_38 = arith.constant 0 : index
    %c0_39 = arith.constant 0 : index
    %69 = vector.load %arg9[%c0_38, %c0_39] : memref<8x128xf32, #tpu.memory_space<vmem>>, vector<8x128xf32>
    tpu.vector_store %arg9[%c0_38, %c0_39], %68 {strides = array<i32>} : memref<8x128xf32, #tpu.memory_space<vmem>>, vector<8x128xf32>,
    return
  }
  func.func @transform_0(%arg0: i32) -> (i32, i32) {
    %c0_i32 = arith.constant 0 : i32
    %c0_i32_0 = arith.constant 0 : i32
    return %arg0, %c0_i32 : i32, i32
  }
  func.func @transform_1(%arg0: i32) -> (i32, i32) {
    %c0_i32 = arith.constant 0 : i32
    %c0_i32_0 = arith.constant 0 : i32
    return %arg0, %c0_i32 : i32, i32
  }
  func.func @transform_2(%arg0: i32) -> (i32, i32) {
    %c0_i32 = arith.constant 0 : i32
    %c0_i32_0 = arith.constant 0 : i32
    %c0_i32_1 = arith.constant 0 : i32
    return %c0_i32, %c0_i32_0 : i32, i32
  }
  func.func @transform_3(%arg0: i32) -> (i32, i32) {
    %c0_i32 = arith.constant 0 : i32
    %c0_i32_0 = arith.constant 0 : i32
    %c0_i32_1 = arith.constant 0 : i32
    return %c0_i32, %c0_i32_0 : i32, i32
  }
  func.func @transform_4(%arg0: i32) -> (i32, i32) {
    %c0_i32 = arith.constant 0 : i32
    %c0_i32_0 = arith.constant 0 : i32
    %c0_i32_1 = arith.constant 0 : i32
    return %c0_i32, %c0_i32_0 : i32, i32
  }
  func.func @transform_5(%arg0: i32) -> (i32, i32) {
    %c0_i32 = arith.constant 0 : i32
    %c0_i32_0 = arith.constant 0 : i32
    %c0_i32_1 = arith.constant 0 : i32
    return %c0_i32, %c0_i32_0 : i32, i32
  }
  func.func @transform_6(%arg0: i32) -> (i32, i32) {
    %c0_i32 = arith.constant 0 : i32
    %c0_i32_0 = arith.constant 0 : i32
    %c0_i32_1 = arith.constant 0 : i32
    return %c0_i32, %c0_i32_0 : i32, i32
  }
  func.func @transform_7(%arg0: i32) -> (i32, i32) {
    %c0_i32 = arith.constant 0 : i32
    %c0_i32_0 = arith.constant 0 : i32
    %c0_i32_1 = arith.constant 0 : i32
    return %c0_i32, %c0_i32_0 : i32, i32
  }
  func.func @transform_8(%arg0: i32) -> (i32, i32) {
    %c0_i32 = arith.constant 0 : i32
    %c0_i32_0 = arith.constant 0 : i32
    return %arg0, %c0_i32 : i32, i32
  }
}

</mosaic_0001>

<bundles_post_ra>
// kernel: tpu_custom_call.1
= control target key start
LH: loop header
LB: loop body
LE: loop exit
PB: predicated region body
PF: predicated region fallthrough
CT: control target
= control target key end

     0   :  { %s2182_s0 = inlined_call_operand.hbm [shape: f32[16,128], index: 0, kind: input, shape index: {}]   ;;  %s2183_s1 = inlined_call_operand.hbm [shape: f32[16,128], index: 1, kind: input, shape index: {}]   ;;  %s2184_s2 = inlined_call_operand.hbm [shape: f32[8,128], index: 2, kind: input, shape index: {}]   ;;  %s2185_s3 = inlined_call_operand.vmem [shape: f32[8,128], index: 3, kind: input, shape index: {}]   ;;  %s2186_s4 = inlined_call_operand.hbm [shape: f32[128,128], index: 4, kind: input, shape index: {}]   ;;  %s2187_s5 = inlined_call_operand.hbm [shape: f32[128,128], index: 5, kind: input, shape index: {}]   ;;  %s2188_s6 = inlined_call_operand.hbm [shape: f32[128,128], index: 6, kind: input, shape index: {}]   ;;  %s2189_s7 = inlined_call_operand.hbm [shape: f32[128,128], index: 7, kind: input, shape index: {}]   ;;  %s2190_s8 = inlined_call_operand.hbm [shape: f32[16,128], index: 8, kind: output, shape index: {}]  }
   0x1   :  { %2195 = sst [smem:[#allocation21_spill]] %s2184_s2 }
   0x2   :  { %2196 = sst [smem:[#allocation22_spill]] %s2186_s4 }
   0x3   :  { %2197 = sst [smem:[#allocation23_spill]] %s2187_s5 }
   0x4   :  { %2198 = sst [smem:[#allocation24_spill]] %s2188_s6 }
   0x5   :  { %2199 = sst [smem:[#allocation25_spill]] %s2189_s7 }
   0x6   :  { %13 = vsyncpa [#allocation3], 0 }
   0x7   :  { %15 = vsyncpa [#allocation3 + $0x1], 0 }
   0x8   :  { %16 = vsyncpa [#allocation6], 0 }
   0x9   :  { %18 = vsyncpa [#allocation6 + $0x1], 0 }
   0xa   :  { %19 = vsyncpa [#allocation9], 0 }
   0xb   :  { %20 = vsyncpa [#allocation12], 0 }
   0xc   :  { %21 = vsyncpa [#allocation4], 0 }
   0xd   :  { %23 = vsyncpa [#allocation4 + $0x1], 0  ;;  %s1779_s27 = smov 0   ;;  %s1781_s28 = smov 0  }
   0xe   :  { %s1783_s29 = smov 0   ;;  %s1785_s30 = smov 0  }
   0xf LB: > { %s1721_s9 = smov [#allocation7]   ;;  %s1800_s11 = sadd.s32 4294967295, %s1719_s30   ;;  %s1719_s30 = sphi %s1785_s30, %s2227_s30   ;;  %s1715_s29 = sphi %s1783_s29, %s2226_s29   ;;  %s1711_s28 = sphi %s1781_s28, %s2225_s28   ;;  %s1707_s27 = sphi %s1779_s27, %s2224_s27  }
  0x10   : > { %s251_s10 = sshll.u32 %s1721_s9, 4  ;;  %p993_p0 = scmp.ge.s32.totalorder %s1719_s30, 1  ;;  %s252_s10 = int_to_ptr.vmem [resolvable:$true] %s251_s10 }
  0x11   : > { %p2191_p1 = scmp.eq.s32.totalorder %s1800_s11, 0  ;;  %p238_p2 = scmp.lt.s32.totalorder %s1719_s30, 3 }
  0x12   : > { %s1722_s13 = smov [#allocation8]   ;;  %s1723_s16 = smov [#allocation11]  }
  0x13   : > { %p1805_p3 = pnand %p993_p0, %p238_p2  ;;  %s264_s14 = sshll.u32 %s1722_s13, 4  ;;  %s1812_s14 = int_to_ptr.vmem [resolvable:$true] %s264_s14 }
  0x14   : > { %s290_s17 = sshll.u32 %s1723_s16, 4  ;;  %s2202_s2 = sld [smem:[#allocation21_spill]]  ;;  %s1820_s17 = int_to_ptr.vmem [resolvable:$true] %s290_s17 }
  0x15   : > { %s2200_s12 = scalar_select %p1805_p3, 1, 0 }
  0x16   : > { %p1354_p5 = pneg %p1805_p3 }
  0x18   : > { %p1816_p6 = pnand %p1354_p5, %p2191_p1 }
  0x1a   : > { %s1437_s20 = scalar_lea.hbm %s2202_s2, 128  ;;  %p1830_p8 = pneg %p1816_p6 }
  0x1b   : > { %p1438_p7 = scmp.ne.s32.totalorder %s2202_s2, %s1437_s20  ;;  %p1444_p11 = scmp.lt.u32.totalorder %s1437_s20, %s2202_s2 }
  0x1d   : > { %p1440_p9 = pnand %p1830_p8, %p1438_p7 }
  0x1f   : > { %p1441_p10 = pneg %p1440_p9 }
  0x21   : > { %p1446_p12 = pnand %p1444_p11, %p1441_p10 }
  0x23   : > { %1449 = shalt.err (!%p1446_p12)
}
  0x24   : > { %s1450_s26 = scalar_lea.vmem %s252_s10, 128  ;;  %p1458_p5 = scmp.lt.s32.totalorder %s252_s10, %s252_s10 }
  0x25   : > { %p1451_p13 = scmp.ne.s32.totalorder %s252_s10, %s1450_s26  ;;  %p1459_p4 = scmp.lt.s32.totalorder %s1450_s26, %s1450_s26 }
  0x27   : > { %p1453_p0 = pnand %p1451_p13, %p1830_p8  ;;  %p1460_p1 = por %p1459_p4, %p1458_p5 }
  0x29   : > { %p1454_p2 = pneg %p1453_p0 }
  0x2b   : > { %p1461_p3 = pnand %p1460_p1, %p1454_p2 }
  0x2d   : > { %1464 = shalt.err (!%p1461_p3)
}
  0x2e   : > { %1357 = dma.hbm_to_vmem [thread:$0]  (!%p1816_p6), %s2202_s2, 128, %s252_s10, [#allocation6]  }
  0x2f   : > { %s2204_s4 = sld [smem:[#allocation22_spill]] }
  0x35   : > { %s1465_s19 = scalar_lea.hbm %s2204_s4, 2048 }
  0x36   : > { %p1466_p7 = scmp.ne.s32.totalorder %s2204_s4, %s1465_s19  ;;  %p1472_p1 = scmp.lt.u32.totalorder %s1465_s19, %s2204_s4 }
  0x38   : > { %p1468_p9 = pnand %p1466_p7, %p1830_p8 }
  0x3a   : > { %p1469_p4 = pneg %p1468_p9 }
  0x3c   : > { %p1474_p3 = pnand %p1472_p1, %p1469_p4 }
  0x3e   : > { %1477 = shalt.err (!%p1474_p3)
}
  0x3f   : > { %s1478_s10 = scalar_lea.vmem %s1812_s14, 2048  ;;  %p1486_p13 = scmp.lt.s32.totalorder %s1812_s14, %s1812_s14 }
  0x40   : > { %p1479_p10 = scmp.ne.s32.totalorder %s1812_s14, %s1478_s10  ;;  %p1487_p0 = scmp.lt.s32.totalorder %s1478_s10, %s1478_s10 }
  0x42   : > { %p1481_p11 = pnand %p1479_p10, %p1830_p8  ;;  %p1488_p2 = por %p1487_p0, %p1486_p13 }
  0x44   : > { %p1482_p12 = pneg %p1481_p11 }
  0x46   : > { %p1489_p5 = pnand %p1488_p2, %p1482_p12 }
  0x48   : > { %1492 = shalt.err (!%p1489_p5)
}
  0x49   : > { %s1724_s25 = smov 128   ;;  %s1725_s26 = smov 8  }
  0x4a   : > { %1360 = dma.hbm_to_vmem [thread:$0]  (!%p1816_p6), %s2204_s4, 2048, %s1812_s14, [#allocation9], %s1724_s25, %s1724_s25, %s1725_s26  }
  0x4b   : > { %s2205_s6 = sld [smem:[#allocation24_spill]] }
  0x51   : > { %s1493_s19 = scalar_lea.hbm %s2205_s6, 2048 }
  0x52   : > { %p1494_p7 = scmp.ne.s32.totalorder %s2205_s6, %s1493_s19  ;;  %p1500_p1 = scmp.lt.u32.totalorder %s1493_s19, %s2205_s6 }
  0x54   : > { %p1496_p9 = pnand %p1494_p7, %p1830_p8 }
  0x56   : > { %p1497_p4 = pneg %p1496_p9 }
  0x58   : > { %p1502_p3 = pnand %p1500_p1, %p1497_p4 }
  0x5a   : > { %1505 = shalt.err (!%p1502_p3)
}
  0x5b   : > { %s1506_s14 = scalar_lea.vmem %s1820_s17, 2048  ;;  %p1514_p13 = scmp.lt.s32.totalorder %s1820_s17, %s1820_s17 }
  0x5c   : > { %p1507_p10 = scmp.ne.s32.totalorder %s1820_s17, %s1506_s14  ;;  %p1515_p0 = scmp.lt.s32.totalorder %s1506_s14, %s1506_s14 }
  0x5e   : > { %p1509_p11 = pnand %p1507_p10, %p1830_p8  ;;  %p1516_p2 = por %p1515_p0, %p1514_p13 }
  0x60   : > { %p1510_p12 = pneg %p1509_p11 }
  0x62   : > { %p1517_p5 = pnand %p1516_p2, %p1510_p12 }
  0x64   : > { %1520 = shalt.err (!%p1517_p5)
}
  0x65   : > { %1366 = dma.hbm_to_vmem [thread:$0]  (!%p1816_p6), %s2205_s6, 2048, %s1820_s17, [#allocation12], %s1724_s25, %s1724_s25, %s1725_s26  }
  0x66   : > { %s1726_s13 = smov [#allocation10]   ;;  %s1727_s18 = smov [#allocation13]  }
  0x67   : > { %s277_s16 = sshll.u32 %s1726_s13, 4  ;;  %s303_s19 = sshll.u32 %s1727_s18, 4  ;;  %s278_s16 = int_to_ptr.vmem [resolvable:$true] %s277_s16  ;;  %s304_s19 = int_to_ptr.vmem [resolvable:$true] %s303_s19 }
  0x68   : > { %s2206_s5 = sld [smem:[#allocation23_spill]] }
  0x6e   : > { %s1521_s22 = scalar_lea.hbm %s2206_s5, 2048 }
  0x6f   : > { %p1522_p7 = scmp.ne.s32.totalorder %s2206_s5, %s1521_s22  ;;  %p1528_p1 = scmp.lt.u32.totalorder %s1521_s22, %s2206_s5 }
  0x71   : > { %p1524_p9 = pnand %p1522_p7, %p1830_p8 }
  0x73   : > { %p1525_p4 = pneg %p1524_p9 }
  0x75   : > { %p1530_p3 = pnand %p1528_p1, %p1525_p4 }
  0x77   : > { %1533 = shalt.err (!%p1530_p3)
}
  0x78   : > { %s1534_s17 = scalar_lea.vmem %s278_s16, 2048  ;;  %p1542_p13 = scmp.lt.s32.totalorder %s278_s16, %s278_s16 }
  0x79   : > { %p1535_p10 = scmp.ne.s32.totalorder %s278_s16, %s1534_s17  ;;  %p1543_p0 = scmp.lt.s32.totalorder %s1534_s17, %s1534_s17 }
  0x7b   : > { %p1537_p11 = pnand %p1535_p10, %p1830_p8  ;;  %p1544_p2 = por %p1543_p0, %p1542_p13 }
  0x7d   : > { %p1538_p12 = pneg %p1537_p11 }
  0x7f   : > { %p1545_p5 = pnand %p1544_p2, %p1538_p12 }
  0x81   : > { %1548 = shalt.err (!%p1545_p5)
}
  0x82   : > { %1363 = dma.hbm_to_vmem [thread:$0]  (!%p1816_p6), %s2206_s5, 2048, %s278_s16, [#allocation9], %s1724_s25, %s1724_s25, %s1725_s26  }
  0x83   : > { %s2207_s7 = sld [smem:[#allocation25_spill]] }
  0x89   : > { %s1549_s20 = scalar_lea.hbm %s2207_s7, 2048 }
  0x8a   : > { %p1550_p7 = scmp.ne.s32.totalorder %s2207_s7, %s1549_s20  ;;  %p1556_p1 = scmp.lt.u32.totalorder %s1549_s20, %s2207_s7 }
  0x8c   : > { %p1552_p9 = pnand %p1550_p7, %p1830_p8 }
  0x8e   : > { %p1553_p4 = pneg %p1552_p9 }
  0x90   : > { %p1558_p3 = pnand %p1556_p1, %p1553_p4 }
  0x92   : > { %1561 = shalt.err (!%p1558_p3)
}
  0x93   : > { %s1562_s10 = scalar_lea.vmem %s304_s19, 2048  ;;  %p1570_p13 = scmp.lt.s32.totalorder %s304_s19, %s304_s19 }
  0x94   : > { %p1563_p10 = scmp.ne.s32.totalorder %s304_s19, %s1562_s10  ;;  %p1571_p0 = scmp.lt.s32.totalorder %s1562_s10, %s1562_s10 }
  0x96   : > { %p1565_p11 = pnand %p1563_p10, %p1830_p8  ;;  %p1572_p2 = por %p1571_p0, %p1570_p13 }
  0x98   : > { %p1566_p12 = pneg %p1565_p11 }
  0x9a   : > { %p1573_p5 = pnand %p1572_p2, %p1566_p12 }
  0x9c   : > { %1576 = shalt.err (!%p1573_p5)
}
  0x9d   : > { %1369 = dma.hbm_to_vmem [thread:$0]  (!%p1816_p6), %s2207_s7, 2048, %s304_s19, [#allocation12], %s1724_s25, %s1724_s25, %s1725_s26  }
  0x9e   : > { %s992_s15 = sadd.s32 4294967294, %s1719_s30   ;;  %s1942_s23 = sadd.s32 1, %s1719_s30  }
  0x9f   : > { %s36_s2 = sadd.s32 1, %s1715_s29  ;;  %s33_s9 = ssub.s32 %s1719_s30, %s1942_s23 }
  0xa0   : > { %p43_p8 = scmp.ne.s32.totalorder %s1715_s29, %s1711_s28  ;;  %p34_p7 = scmp.eq.s32.totalorder %s33_s9, 0 }
  0xa1   : > { %p44_p9 = scmp.eq.s32.totalorder %s1719_s30, 0  ;;  %p49_p4 = scmp.ne.s32.totalorder %s1711_s28, %s1707_s27 }
  0xa2   : > { %p225_p1 = scmp.eq.s32.totalorder %s1800_s11, 1  ;;  %p2208_p10 = scmp.eq.s32.totalorder %s1800_s11, 0 }
  0xa3   : > { %s1954_s13 = scalar_select %p34_p7, %s1715_s29, %s36_s2  }
  0xa4   : > { %p45_p3 = por %p44_p9, %p43_p8  ;;  %p1958_p11 = por %p2208_p10, %p49_p4 }
  0xa5   : > { %p1962_p6 = por %p225_p1, %p43_p8  ;;  %p231_p12 = scmp.eq.s32.totalorder %s992_s15, 1 }
  0xa6   : > { %s2209_s18 = scalar_select %p1958_p11, 1, 0 }
  0xa7   : > { %s2210_s25 = scalar_select %p1962_p6, 1, 0 }
  0xa8   : > { %p1386_p13 = scmp.lt.s32.totalorder %s1719_s30, 2  ;;  %s317_s26 = sand.u32 1, %s1715_s29  }
  0xa9   : > { %p1968_p0 = por %p231_p12, %p49_p4  ;;  %s1972_s20 = sshll.u32 %s317_s26, 3 }
  0xaa   : > { %s1001_s21 = sshll.u32 %s1719_s30, 7  ;;  %s321_s10 = scalar_lea.vmem [#allocation2], %s1972_s20 }
  0xab   : > { %s2211_s19 = scalar_select %p1968_p0, 1, 0 }
  0xac   : > { %s1978_s14 = scalar_lea.hbm %s2182_s0, %s1001_s21  ;;  %s328_s16 = sshll.u32 %s321_s10, 4  ;;  %s1985_s16 = int_to_ptr.vmem [resolvable:$true] %s328_s16 }
  0xad   : > { %p1981_p2 = pnand %p1386_p13, %p45_p3  ;;  %s1990_s9 = scalar_lea.hbm %s2183_s1, %s1001_s21 }
  0xae   : > { %s318_s22 = scalar_lea.sflag [#allocation3], %s317_s26  ;;  %s1577_s24 = scalar_lea.hbm %s1978_s14, 128 }
  0xaf   : > { %p1578_p5 = scmp.ne.s32.totalorder %s1978_s14, %s1577_s24  ;;  %p1579_p8 = pneg %p1981_p2 }
  0xb0   : > { %s1582_s5 = scalar_lea.hbm %s2182_s0, 256  ;;  %p1583_p4 = scmp.lt.u32.totalorder %s1978_s14, %s2182_s0 }
  0xb1   : > { %p1580_p7 = pnand %p1579_p8, %p1578_p5  ;;  %p1584_p1 = scmp.lt.u32.totalorder %s1582_s5, %s1577_s24 }
  0xb2   : > { %p1586_p10 = scmp.lt.u32.totalorder %s1577_s24, %s1978_s14 }
  0xb3   : > { %p1581_p9 = pneg %p1580_p7  ;;  %p1585_p3 = por %p1584_p1, %p1583_p4 }
  0xb5   : > { %p1587_p12 = por %p1586_p10, %p1585_p3 }
  0xb7   : > { %p1588_p13 = pnand %p1587_p12, %p1581_p9 }
  0xb9   : > { %1591 = shalt.err (!%p1588_p13)
}
  0xba   : > { %s1592_s26 = scalar_lea.vmem %s1985_s16, 128  ;;  %s1728_s4 = smov [#allocation2]  }
  0xbb   : > { %p1593_p5 = scmp.ne.s32.totalorder %s1985_s16, %s1592_s26  ;;  %s1597_s21 = sshll.u32 %s1728_s4, 4  ;;  %s1598_s21 = int_to_ptr.vmem [resolvable:$false] %s1597_s21 }
  0xbc   : > { %s1599_s6 = scalar_lea.vmem %s1598_s21, 256  ;;  %p1600_p6 = scmp.lt.s32.totalorder %s1985_s16, %s1598_s21 }
  0xbd   : > { %p1595_p7 = pnand %p1593_p5, %p1579_p8  ;;  %p1601_p4 = scmp.lt.s32.totalorder %s1599_s6, %s1592_s26 }
  0xbf   : > { %p1596_p0 = pneg %p1595_p7  ;;  %p1602_p1 = por %p1601_p4, %p1600_p6 }
  0xc1   : > { %p1603_p3 = pnand %p1602_p1, %p1596_p0 }
  0xc3   : > { %1606 = shalt.err (!%p1603_p3)
}
  0xc4   : > { %1373 = dma.hbm_to_vmem [thread:$0]  (!%p1981_p2), %s1978_s14, 128, %s1985_s16, %s318_s22  }
  0xc5   : > { %s335_s5 = sand.u32 1, %s1719_s30   ;;  %s339_s7 = scalar_lea.vmem [#allocation5], %s1972_s20 }
  0xc6   : > { %s346_s15 = sshll.u32 %s339_s7, 4  ;;  %s336_s2 = scalar_lea.sflag [#allocation6], %s335_s5  ;;  %s347_s15 = int_to_ptr.vmem [resolvable:$true] %s346_s15 }
  0xc7   : > { %s1607_s24 = scalar_lea.hbm %s1990_s9, 128  ;;  %s1612_s4 = scalar_lea.hbm %s2183_s1, 256 }
  0xc8   : > { %p1608_p6 = scmp.ne.s32.totalorder %s1990_s9, %s1607_s24  ;;  %p1613_p10 = scmp.lt.u32.totalorder %s1990_s9, %s2183_s1 }
  0xc9   : > { %p1614_p12 = scmp.lt.u32.totalorder %s1612_s4, %s1607_s24  ;;  %p1616_p5 = scmp.lt.u32.totalorder %s1607_s24, %s1990_s9 }
  0xca   : > { %p1610_p0 = pnand %p1608_p6, %p1579_p8 }
  0xcb   : > { %p1615_p13 = por %p1614_p12, %p1613_p10 }
  0xcc   : > { %p1611_p9 = pneg %p1610_p0 }
  0xcd   : > { %p1617_p7 = por %p1616_p5, %p1615_p13 }
  0xcf   : > { %p1618_p4 = pnand %p1617_p7, %p1611_p9 }
  0xd1   : > { %1621 = shalt.err (!%p1618_p4)
}
  0xd2   : > { %s1622_s20 = scalar_lea.vmem %s347_s15, 128  ;;  %s1729_s14 = smov [#allocation5]  }
  0xd3   : > { %p1623_p1 = scmp.ne.s32.totalorder %s347_s15, %s1622_s20  ;;  %s1627_s16 = sshll.u32 %s1729_s14, 4  ;;  %s1628_s16 = int_to_ptr.vmem [resolvable:$false] %s1627_s16 }
  0xd4   : > { %s1629_s22 = scalar_lea.vmem %s1628_s16, 256  ;;  %p1630_p0 = scmp.lt.s32.totalorder %s347_s15, %s1628_s16 }
  0xd5   : > { %p1625_p3 = pnand %p1623_p1, %p1579_p8  ;;  %p1631_p11 = scmp.lt.s32.totalorder %s1629_s22, %s1622_s20 }
  0xd7   : > { %p1626_p6 = pneg %p1625_p3  ;;  %p1632_p10 = por %p1631_p11, %p1630_p0 }
  0xd9   : > { %p1633_p12 = pnand %p1632_p10, %p1626_p6 }
  0xdb   : > { %1636 = shalt.err (!%p1633_p12)
}
  0xdc   : > { %1376 = dma.hbm_to_vmem [thread:$0]  (!%p1981_p2), %s1990_s9, 128, %s347_s15, %s336_s2  }
  0xdd   : > { %p2213_p9 = scmp.ne.s32.totalorder %s2200_s12, 0 }
  0xde   : > { %s2041_s5 = sand.u32 (!%p2213_p9), 1, %s1711_s28   ;;  %p2214_p11 = scmp.ne.s32.totalorder (!%p2213_p9), %s2209_s18, 0 }
  0xdf   : > { %355 = sbr.rel (%p2213_p9) target bundleno = 1038 (0x40e), region = 52  ;;  %s2044_s7 = sshll.u32 (!%p2213_p9), %s2041_s5, 3 }
  0xe0   : > { %s358_s24 = scalar_lea.sflag (!%p2213_p9), [#allocation3], %s2041_s5  ;;  %s361_s10 = scalar_lea.vmem (!%p2213_p9), [#allocation2], %s2044_s7 }
  0xe6   : > { %1682 = dma.done.wait (%p2214_p11), %s358_s24, 128  }
  0xe7   : > { %1684 = vsyncadd (%p2214_p11), %s358_s24, 4294967168  ;;  %s366_s12 = sand.u32 1, %s1800_s11   ;;  %s370_s9 = scalar_lea.vmem [#allocation5], %s2044_s7 }
  0xe8   : > { %s367_s17 = scalar_lea.sflag [#allocation6], %s366_s12 }
  0xe9   : > { %1686 = dma.done.wait (%p2214_p11), %s367_s17, 128  }
  0xea   : > { %1688 = vsyncadd (%p2214_p11), %s367_s17, 4294967168  ;;  %p2215_p2 = scmp.eq.s32.totalorder %s1800_s11, 0 }
  0xec   : > { %1690 = dma.done.wait (%p2215_p2), [#allocation6], 128   ;;  %p2216_p8 = pmov %p2215_p2 }
  0xed   : > { %p2217_p13 = pmov %p2215_p2 }
  0xee   : > { %1692 = vsyncadd (%p2216_p8), [#allocation6], 4294967168 }
  0xef   : > { %1694 = dma.done.wait (%p2217_p13), [#allocation9], 4096   ;;  %p2218_p5 = pmov %p2215_p2 }
  0xf0   : > { %p2219_p7 = pmov %p2215_p2 }
  0xf1   : > { %1696 = vsyncadd (%p2218_p5), [#allocation9], 4294963200 }
  0xf2   : > { %1698 = dma.done.wait (%p2219_p7), [#allocation12], 4096   ;;  %p2220_p4 = pmov %p2215_p2 }
  0xf3   : > { %v2070_v0 = vld [vmem:[%s361_s10] sm:$0xff]  ;;  %v463_v2 = vld [vmem:[#allocation8 + $0x8] sm:$0xff]  ;;  %v464_v3 = vld [vmem:[#allocation8 + $0x10] sm:$0xff]  ;;  %v1730_v4 = vmov 0.0|0.0   ;;  %vm1731_vm0 = vmmov 0   ;;  %v1732_v26 = vmov 0.0  }
  0xf4   : > { %1700 = vsyncadd (%p2220_p4), [#allocation12], 4294963200  ;;  %429 = vadd.xlane.f32.xlu0 %v2070_v0  ;;  %v462_v1 = vld [vmem:[#allocation8] sm:$0xff]  ;;  %1232 = vmatprep.subr.bf16.mxu0 %v1730_v4  ;;  %v465_v6 = vld [vmem:[#allocation8 + $0x18] sm:$0xff]  ;;  %s1021_s14 = sshll.u32 %s1800_s11, 7  ;;  %s427_s16 = scalar_lea.vmem [#allocation14], %s2044_s7 }
  0xf5   : > { %v1233_v5 = vpack.c.bf16 %v463_v2, %v462_v1  ;;  %1256 = vmatprep.subr.bf16.mxu1 %v1730_v4  ;;  %v1236_v7 = vpack.c.bf16 %v465_v6, %v464_v3  ;;  %v466_v8 = vld [vmem:[#allocation8 + $0x20] sm:$0xff]  ;;  %v467_v9 = vld [vmem:[#allocation8 + $0x28] sm:$0xff]  ;;  %v1013_v13 = vld [vmem:[#allocation7 + $0x2] ss:$0 sm:$0xff]  ;;  %1124 = vmatprep.mubr.msk.f32.mxu0 %vm1731_vm0, %v1732_v26  ;;  %s852_s22 = sshll.u32 %s427_s16, 4  ;;  %s2138_s12 = scalar_lea.hbm %s2190_s8, %s1021_s14  ;;  %s2140_s22 = int_to_ptr.vmem [resolvable:$true] %s852_s22 }
  0xf6   : > { %v1239_v10 = vpack.c.bf16 %v467_v9, %v466_v8  ;;  %v468_v17 = vld [vmem:[#allocation8 + $0x30] sm:$0xff]  ;;  %v469_v18 = vld [vmem:[#allocation8 + $0x38] sm:$0xff]  ;;  %v470_v20 = vld [vmem:[#allocation8 + $0x40] sm:$0xff]  ;;  %1159 = vmatprep.mubr.msk.f32.mxu1 %vm1731_vm0, %v1732_v26  ;;  %s839_s17 = scalar_lea.sflag [#allocation4], %s2041_s5  ;;  %p2221_p3 = scmp.ne.s32.totalorder %s2210_s25, 0 }
  0xf7   : > { %1234 = vmatpush3.bf16.msra.mxu0 %v1233_v5  ;;  %v1242_v19 = vpack.c.bf16 %v469_v18, %v468_v17  ;;  %v471_v21 = vld [vmem:[#allocation8 + $0x48] sm:$0xff]  ;;  %v472_v23 = vld [vmem:[#allocation8 + $0x50] sm:$0xff]  ;;  %v473_v24 = vld [vmem:[#allocation8 + $0x58] sm:$0xff]  ;;  %s1733_s11 = smov [#allocation14]  }
  0xf8   : > { %1235 = vmatprep.subr.bf16.mxu0 %v1730_v4  ;;  %v1245_v22 = vpack.c.bf16 %v471_v21, %v470_v20  ;;  %v1248_v25 = vpack.c.bf16 %v473_v24, %v472_v23  ;;  %v474_v27 = vld [vmem:[#allocation8 + $0x60] sm:$0xff]  ;;  %v475_v28 = vld [vmem:[#allocation8 + $0x68] sm:$0xff]  ;;  %v476_v30 = vld [vmem:[#allocation8 + $0x70] sm:$0xff]  ;;  %s1641_s7 = sshll.u32 %s1733_s11, 4  ;;  %s1642_s7 = int_to_ptr.vmem [resolvable:$false] %s1641_s7 }
  0xf9   : > { %v1251_v29 = vpack.c.bf16 %v475_v28, %v474_v27  ;;  %v477_v31 = vld [vmem:[#allocation8 + $0x78] sm:$0xff]  ;;  %v556_v33 = vld [vmem:[#allocation10] sm:$0xff]  ;;  %v557_v34 = vld [vmem:[#allocation10 + $0x8] sm:$0xff]  ;;  %s1643_s18 = scalar_lea.vmem %s1642_s7, 256  ;;  %p1644_p10 = scmp.lt.s32.totalorder %s2140_s22, %s1642_s7 }
  0xfa   : > { %v1254_v32 = vpack.c.bf16 %v477_v31, %v476_v30  ;;  %v558_v35 = vld [vmem:[#allocation10 + $0x10] sm:$0xff]  ;;  %v1257_v36 = vpack.c.bf16 %v557_v34, %v556_v33  ;;  %v559_v37 = vld [vmem:[#allocation10 + $0x18] sm:$0xff]  ;;  %v560_v39 = vld [vmem:[#allocation10 + $0x20] sm:$0xff] }
  0xfb   : > { %1237 = vmatpush3.bf16.msra.mxu0 %v1236_v7  ;;  %v1260_v38 = vpack.c.bf16 %v559_v37, %v558_v35  ;;  %v561_v40 = vld [vmem:[#allocation10 + $0x28] sm:$0xff]  ;;  %v562_v42 = vld [vmem:[#allocation10 + $0x30] sm:$0xff]  ;;  %v563_v43 = vld [vmem:[#allocation10 + $0x38] sm:$0xff] }
  0xfc   : > { %1238 = vmatprep.subr.bf16.mxu0 %v1730_v4  ;;  %1258 = vmatpush3.bf16.msra.mxu1 %v1257_v36  ;;  %v1263_v41 = vpack.c.bf16 %v561_v40, %v560_v39  ;;  %v1266_v44 = vpack.c.bf16 %v563_v43, %v562_v42  ;;  %v564_v45 = vld [vmem:[#allocation10 + $0x40] sm:$0xff]  ;;  %v565_v46 = vld [vmem:[#allocation10 + $0x48] sm:$0xff]  ;;  %v566_v48 = vld [vmem:[#allocation10 + $0x50] sm:$0xff] }
  0xfd   : > { %1259 = vmatprep.subr.bf16.mxu1 %v1730_v4  ;;  %v1269_v47 = vpack.c.bf16 %v565_v46, %v564_v45  ;;  %v567_v49 = vld [vmem:[#allocation10 + $0x58] sm:$0xff]  ;;  %v568_v51 = vld [vmem:[#allocation10 + $0x60] sm:$0xff]  ;;  %v569_v52 = vld [vmem:[#allocation10 + $0x68] sm:$0xff] }
  0xfe   : > { %v1272_v50 = vpack.c.bf16 %v567_v49, %v566_v48  ;;  %v1275_v53 = vpack.c.bf16 %v569_v52, %v568_v51  ;;  %v1014_v58 = vld [vmem:[#allocation7] ss:$0 sm:$0xff]  ;;  %v650_v60 = vld [vmem:[#allocation11] sm:$0xff]  ;;  %v651_v61 = vld [vmem:[#allocation11 + $0x8] sm:$0xff] }
  0xff   : > { %1240 = vmatpush3.bf16.msra.mxu0 %v1239_v10  ;;  %v1015_v62 = vld [vmem:[#allocation7 + $0x1] ss:$0 sm:$0xff]  ;;  %v1281_v1 = vpack.c.bf16 %v651_v61, %v650_v60  ;;  %v652_v3 = vld [vmem:[#allocation11 + $0x10] sm:$0xff]  ;;  %v654_v7 = vld [vmem:[#allocation11 + $0x20] sm:$0xff] }
 0x100   : > { %1241 = vmatprep.subr.bf16.mxu0 %v1730_v4  ;;  %1261 = vmatpush3.bf16.msra.mxu1 %v1260_v38  ;;  %v653_v5 = vld [vmem:[#allocation11 + $0x18] sm:$0xff]  ;;  %v655_v8 = vld [vmem:[#allocation11 + $0x28] sm:$0xff]  ;;  %v656_v10 = vld [vmem:[#allocation11 + $0x30] sm:$0xff] }
 0x101   : > { %1262 = vmatprep.subr.bf16.mxu1 %v1730_v4  ;;  %v1284_v6 = vpack.c.bf16 %v653_v5, %v652_v3  ;;  %v1287_v9 = vpack.c.bf16 %v655_v8, %v654_v7  ;;  %v661_v17 = vld [vmem:[#allocation11 + $0x58] sm:$0xff]  ;;  %v663_v20 = vld [vmem:[#allocation11 + $0x68] sm:$0xff]  ;;  %v744_v34 = vld [vmem:[#allocation13 + $0x10] sm:$0xff] }
 0x102   : > { %v665_v23 = vld [vmem:[#allocation11 + $0x78] sm:$0xff]  ;;  %v458_v24 = vld [vmem:[%s370_s9] sm:$0xff]  ;;  %v746_v38 = vld [vmem:[#allocation13 + $0x20] sm:$0xff]  ;;  %s1637_s9 = scalar_lea.vmem %s2140_s22, 128 }
 0x103   : > { %1243 = vmatpush3.bf16.msra.mxu0 %v1242_v19  ;;  %v662_v19 = vld [vmem:[#allocation11 + $0x60] sm:$0xff]  ;;  %v460_v27 = vmul.f32 0.1, %v458_v24  ;;  %vm459_vm1 = vcmp.gt.f32.partialorder %v458_v24, 0.0  ;;  %v571_v30 = vld [vmem:[#allocation10 + $0x78] sm:$0xff]  ;;  %v743_v33 = vld [vmem:[#allocation13 + $0x8] sm:$0xff]  ;;  %p1638_p1 = scmp.ne.s32.totalorder %s2140_s22, %s1637_s9  ;;  %p1645_p12 = scmp.lt.s32.totalorder %s1643_s18, %s1637_s9 }
 0x104   : > { %1244 = vmatprep.subr.bf16.mxu0 %v1730_v4  ;;  %1264 = vmatpush3.bf16.msra.mxu1 %v1263_v41  ;;  %v1299_v21 = vpack.c.bf16 %v663_v20, %v662_v19  ;;  %v745_v36 = vld [vmem:[#allocation13 + $0x18] sm:$0xff]  ;;  %v747_v39 = vld [vmem:[#allocation13 + $0x28] sm:$0xff]  ;;  %v748_v41 = vld [vmem:[#allocation13 + $0x30] sm:$0xff] }
 0x105   : > { %1265 = vmatprep.subr.bf16.mxu1 %v1730_v4  ;;  %v461_v28 = vsel %vm459_vm1, %v458_v24, %v460_v27  ;;  %v1308_v37 = vpack.c.bf16 %v745_v36, %v744_v34  ;;  %v1311_v40 = vpack.c.bf16 %v747_v39, %v746_v38  ;;  %v749_v42 = vld [vmem:[#allocation13 + $0x38] sm:$0xff]  ;;  %v752_v45 = vld [vmem:[#allocation13 + $0x50] sm:$0xff]  ;;  %v754_v48 = vld [vmem:[#allocation13 + $0x60] sm:$0xff]  ;;  %p1639_p6 = pnand %p1638_p1, %p2221_p3  ;;  %p1646_p9 = por %p1645_p12, %p1644_p10 }
 0x106   : > { %v1314_v43 = vpack.c.bf16 %v749_v42, %v748_v41  ;;  %v753_v46 = vld [vmem:[#allocation13 + $0x58] sm:$0xff]  ;;  %v755_v49 = vld [vmem:[#allocation13 + $0x68] sm:$0xff]  ;;  %v756_v51 = vld [vmem:[#allocation13 + $0x70] sm:$0xff] }
 0x107   : > { %1246 = vmatpush3.bf16.msra.mxu0 %v1245_v22  ;;  %v664_v22 = vld [vmem:[#allocation11 + $0x70] sm:$0xff]  ;;  %v757_v52 = vld [vmem:[#allocation13 + $0x78] sm:$0xff]  ;;  %p1640_p0 = pneg %p1639_p6 }
 0x108   : > { %1247 = vmatprep.subr.bf16.mxu0 %v1730_v4  ;;  %1267 = vmatpush3.bf16.msra.mxu1 %v1266_v44  ;;  %v751_v44 = vld [vmem:[#allocation13 + $0x48] sm:$0xff]  ;;  %v1017_v3 = vld [vmem:[%s2185_s3 + $0x1] ss:$0 sm:$0xff] }
 0x109   : > { %1268 = vmatprep.subr.bf16.mxu1 %v1730_v4  ;;  %p1647_p11 = pnand %p1646_p9, %p1640_p0 }
 0x10b   : > { %1249 = vmatpush3.bf16.msra.mxu0 %v1248_v25  ;;  %v1302_v25 = vpack.c.bf16 %v665_v23, %v664_v22 }
 0x10c   : > { %1250 = vmatprep.subr.bf16.mxu0 %v1730_v4  ;;  %1270 = vmatpush3.bf16.msra.mxu1 %v1269_v47  ;;  %v1320_v47 = vpack.c.bf16 %v753_v46, %v752_v45 }
 0x10d   : > { %1271 = vmatprep.subr.bf16.mxu1 %v1730_v4 }
 0x10f   : > { %1252 = vmatpush3.bf16.msra.mxu0 %v1251_v29  ;;  %v570_v29 = vld [vmem:[#allocation10 + $0x70] sm:$0xff] }
 0x110   : > { %1253 = vmatprep.subr.bf16.mxu0 %v1730_v4  ;;  %1273 = vmatpush3.bf16.msra.mxu1 %v1272_v50  ;;  %v1278_v31 = vpack.c.bf16 %v571_v30, %v570_v29  ;;  %v1323_v50 = vpack.c.bf16 %v755_v49, %v754_v48 }
 0x111   : > { %1274 = vmatprep.subr.bf16.mxu1 %v1730_v4 }
 0x113   : > { %1255 = vmatpush3.bf16.msra.mxu0 %v1254_v32  ;;  %v742_v32 = vld [vmem:[#allocation13] sm:$0xff] }
 0x114   : > { %1280 = vmatprep.subr.bf16.mxu0 %v1730_v4  ;;  %1276 = vmatpush3.bf16.msra.mxu1 %v1275_v53  ;;  %v1305_v35 = vpack.c.bf16 %v743_v33, %v742_v32  ;;  %v1326_v53 = vpack.c.bf16 %v757_v52, %v756_v51 }
 0x115   : > { %1277 = vmatprep.subr.bf16.mxu1 %v1730_v4 }
 0x118   : > { %1279 = vmatpush3.bf16.msra.mxu1 %v1278_v31 }
 0x119   : > { %1304 = vmatprep.subr.bf16.mxu1 %v1730_v4 }
 0x11b   : > { %1160 = vmatmul.mubr.f32.vlgmr.msra.gmra.mrb[0].mxu1 %v2070_v0 }
 0x11c   : > { %1229 = vmatprep.mubr.msk.f32.mxu1 %vm1731_vm0, %v1732_v26  ;;  %1306 = vmatpush3.bf16.msra.mxu1 %v1305_v35 }
 0x11d   : > { %1307 = vmatprep.subr.bf16.mxu1 %v1730_v4 }
 0x120   : > { %1309 = vmatpush3.bf16.msra.mxu1 %v1308_v37 }
 0x121   : > { %1310 = vmatprep.subr.bf16.mxu1 %v1730_v4 }
 0x124   : > { %1312 = vmatpush3.bf16.msra.mxu1 %v1311_v40 }
 0x125   : > { %1313 = vmatprep.subr.bf16.mxu1 %v1730_v4 }
 0x128   : > { %1315 = vmatpush3.bf16.msra.mxu1 %v1314_v43 }
 0x129   : > { %1316 = vmatprep.subr.bf16.mxu1 %v1730_v4 }
 0x181   : > { %v430_v11 = vpop.xlane.xlu0 %429 }
 0x182   : > { %v431_v12 = vmul.f32 0.03125, %v430_v11  ;;  %v657_v11 = vld [vmem:[#allocation11 + $0x38] sm:$0xff] }
 0x184   : > { %v2079_v14 = vsub.f32 %v2070_v0, %v431_v12  ;;  %v1290_v12 = vpack.c.bf16 %v657_v11, %v656_v10  ;;  %v750_v0 = vld [vmem:[#allocation13 + $0x40] sm:$0xff] }
 0x186   : > { %v438_v15 = vmul.f32 %v1013_v13, %v2079_v14  ;;  %v658_v13 = vld [vmem:[#allocation11 + $0x40] sm:$0xff] }
 0x188   : > { %v439_v16 = vmul.f32 %v438_v15, %v438_v15 }
 0x18a   : > { %440 = vadd.xlane.f32.xlu0 %v439_v16  ;;  %v660_v16 = vld [vmem:[#allocation11 + $0x50] sm:$0xff] }
 0x18b   : > { %v1296_v18 = vpack.c.bf16 %v661_v17, %v660_v16 }
 0x217   : > { %v441_v54 = vpop.xlane.xlu0 %440 }
 0x218   : > { %v442_v55 = vmul.f32 0.03125, %v441_v54 }
 0x21a   : > { %v443_v56 = vadd.f32 1e-05, %v442_v55 }
 0x21c   : > { %1435 = vrsqrt.f32 %v443_v56  ;;  %v1016_v56 = vld [vmem:[%s2185_s3] ss:$0 sm:$0xff] }
 0x226   : > { %v1436_v57 = vpop.eup %1435 }
 0x227   : > { %v445_v59 = vmul.f32 %v1436_v57, %v2079_v14  ;;  %v659_v14 = vld [vmem:[#allocation11 + $0x48] sm:$0xff] }
 0x228   : > { %v1293_v15 = vpack.c.bf16 %v659_v14, %v658_v13 }
 0x229   : > { %v451_v63 = vmul.f32 %v1014_v58, %v445_v59  ;;  %v1018_v59 = vld [vmem:[%s2185_s3 + $0x2] ss:$0 sm:$0xff] }
 0x22b   : > { %v457_v2 = vadd.f32 %v1015_v62, %v451_v63 }
 0x22d   : > { %1125 = vmatmul.mubr.f32.vlgmr.msra.gmra.mrb[0].mxu0 %v457_v2 }
 0x22e   : > { %1282 = vmatpush3.bf16.msra.mxu0 %v1281_v1  ;;  %1194 = vmatprep.mubr.msk.f32.mxu0 %vm1731_vm0, %v1732_v26  ;;  %v1317_v26 = vpack.c.bf16 %v751_v44, %v750_v0  ;;  %v643_v1 = vpop.f32.mrb[0].mxu1 }
 0x22f   : > { %1283 = vmatprep.subr.bf16.mxu0 %v1730_v4  ;;  %v1161_v2 = vpop.f32.mrb[1].mxu1  ;;  %v644_v5 = vadd.f32 %v1017_v3, %v643_v1 }
 0x230   : > { %1318 = vmatpush3.bf16.msra.mxu1 %v1317_v26 }
 0x231   : > { %1319 = vmatprep.subr.bf16.mxu1 %v1730_v4  ;;  %v648_v8 = vmul.f32 0.1, %v644_v5  ;;  %vm647_vm3 = vcmp.gt.f32.partialorder %v644_v5, 0.0 }
 0x232   : > { %1285 = vmatpush3.bf16.msra.mxu0 %v1284_v6  ;;  %v1019_v6 = vld [vmem:[%s2185_s3 + $0x3] ss:$0 sm:$0xff] }
 0x233   : > { %1286 = vmatprep.subr.bf16.mxu0 %v1730_v4 }
 0x234   : > { %1321 = vmatpush3.bf16.msra.mxu1 %v1320_v47 }
 0x235   : > { %1322 = vmatprep.subr.bf16.mxu1 %v1730_v4 }
 0x236   : > { %1288 = vmatpush3.bf16.msra.mxu0 %v1287_v9 }
 0x237   : > { %1289 = vmatprep.subr.bf16.mxu0 %v1730_v4 }
 0x238   : > { %1324 = vmatpush3.bf16.msra.mxu1 %v1323_v50 }
 0x239   : > { %1325 = vmatprep.subr.bf16.mxu1 %v1730_v4 }
 0x23a   : > { %1291 = vmatpush3.bf16.msra.mxu0 %v1290_v12  ;;  %v649_v12 = vsel %vm647_vm3, %v644_v5, %v648_v8 }
 0x23b   : > { %1292 = vmatprep.subr.bf16.mxu0 %v1730_v4 }
 0x23c   : > { %1327 = vmatpush3.bf16.msra.mxu1 %v1326_v53 }
 0x23e   : > { %1294 = vmatpush3.bf16.msra.mxu0 %v1293_v15 }
 0x23f   : > { %1295 = vmatprep.subr.bf16.mxu0 %v1730_v4 }
 0x242   : > { %1297 = vmatpush3.bf16.msra.mxu0 %v1296_v18 }
 0x243   : > { %1298 = vmatprep.subr.bf16.mxu0 %v1730_v4 }
 0x246   : > { %1300 = vmatpush3.bf16.msra.mxu0 %v1299_v21 }
 0x247   : > { %1301 = vmatprep.subr.bf16.mxu0 %v1730_v4 }
 0x24a   : > { %1303 = vmatpush3.bf16.msra.mxu0 %v1302_v25 }
 0x24d   : > { %1195 = vmatmul.mubr.f32.vlgmr.msra.gmra.mrb[2].mxu0 %v461_v28 }
 0x300   : > { %v549_v54 = vpop.f32.mrb[0].mxu0 }
 0x301   : > { %v1126_v55 = vpop.f32.mrb[1].mxu0  ;;  %v550_v57 = vadd.f32 %v1016_v56, %v549_v54 }
 0x303   : > { %v554_v58 = vmul.f32 0.1, %v550_v57  ;;  %vm553_vm2 = vcmp.gt.f32.partialorder %v550_v57, 0.0 }
 0x305   : > { %v555_v62 = vsel %vm553_vm2, %v550_v57, %v554_v58 }
 0x320   : > { %v737_v60 = vpop.f32.mrb[2].mxu0 }
 0x321   : > { %v738_v61 = vadd.f32 %v1018_v59, %v737_v60  ;;  %v1196_v4 = vpop.f32.mrb[3].mxu0 }
 0x323   : > { %v741_v63 = vadd.f32 %v738_v61, %v555_v62 }
 0x325   : > { %1230 = vmatmul.mubr.f32.vlgmr.msra.gmra.mrb[2].mxu1 %v741_v63 }
 0x3f8   : > { %v829_v7 = vpop.f32.mrb[2].mxu1 }
 0x3f9   : > { %v830_v9 = vadd.f32 %v1019_v6, %v829_v7  ;;  %v1231_v10 = vpop.f32.mrb[3].mxu1 }
 0x3fb   : > { %vm833_vm4 = vcmp.gt.f32.partialorder %v830_v9, 0.0  ;;  %v834_v11 = vmul.f32 0.1, %v830_v9 }
 0x3fd   : > { %v835_v13 = vsel %vm833_vm4, %v830_v9, %v834_v11 }
 0x3fe   : > { %v836_v14 = vadd.f32 %v835_v13, %v649_v12 }
 0x400   : > { %837 = vst [vmem:[%s427_s16] sm:$0xff] %v836_v14 }
 0x401   : > { %1650 = shalt.err (!%p1647_p11)
}
 0x402   : > { %s1651_s5 = scalar_lea.hbm %s2138_s12, 128  ;;  %s1655_s26 = scalar_lea.hbm %s2190_s8, 256 }
 0x403   : > { %p1652_p2 = scmp.ne.s32.totalorder %s2138_s12, %s1651_s5  ;;  %p1656_p5 = scmp.lt.u32.totalorder %s2138_s12, %s2190_s8 }
 0x404   : > { %p1657_p7 = scmp.lt.u32.totalorder %s1655_s26, %s1651_s5  ;;  %p1659_p1 = scmp.lt.u32.totalorder %s1651_s5, %s2138_s12 }
 0x405   : > { %p1653_p8 = pnand %p1652_p2, %p2221_p3 }
 0x406   : > { %p1658_p4 = por %p1657_p7, %p1656_p5 }
 0x407   : > { %p1654_p13 = pneg %p1653_p8 }
 0x408   : > { %p1660_p6 = por %p1659_p1, %p1658_p4 }
 0x40a   : > { %p1661_p0 = pnand %p1660_p6, %p1654_p13 }
 0x40c   : > { %1664 = shalt.err (!%p1661_p0)
}
 0x40d   : > { %1352 = dma.vmem_to_hbm [thread:$0]  (%p2221_p3), %s2140_s22, 128, %s2138_s12, %s839_s17  }
 0x40e PF: > { %s864_s6 = sand.u32 1, %s1707_s27   ;;  %p2222_p10 = scmp.ne.s32.totalorder %s2211_s19, 0 }
 0x40f   : > { %p2223_p12 = scmp.ge.s32.totalorder %s1719_s30, 2  ;;  %s865_s20 = scalar_lea.sflag [#allocation4], %s864_s6 }
 0x411   : > { %p1378_p9 = pnand %p2223_p12, %p2222_p10 }
 0x413   : > { %1702 = dma.done.wait (!%p1378_p9), %s865_s20, 128  }
 0x414   : > { %1704 = vsyncadd (!%p1378_p9), %s865_s20, 4294967168  ;;  %p26_p11 = scmp.ge.s32.totalorder %s1942_s23, 4   ;;  %s2224_s27 = smov %s1711_s28 }
 0x415   : > { %s2225_s28 = smov %s1715_s29  ;;  %s2226_s29 = smov %s1954_s13 }
 0x416   : > { %s2227_s30 = smov %s1942_s23  ;;  %28 = sbr.rel (!%p26_p11) target bundleno = 15 (0xf), region = 130 }
 0x41d   :  { %870 = vsyncpa [#allocation3], 1 }
 0x41e   :  { %872 = vsyncpa [#allocation3 + $0x1], 1 }
 0x41f   :  { %873 = vsyncpa [#allocation6], 1 }
 0x420   :  { %875 = vsyncpa [#allocation6 + $0x1], 1 }
 0x421   :  { %876 = vsyncpa [#allocation9], 1 }
 0x422   :  { %877 = vsyncpa [#allocation12], 1 }
 0x423   :  { %878 = vsyncpa [#allocation4], 1 }
 0x424   :  { %880 = vsyncpa [#allocation4 + $0x1], 1 }

</bundles_post_ra>
